<compile_context>
chip_gen: v7x
topology: tpu7x:2x2x1
jax: 0.10.0
libtpu: 0.0.40
codegen_flags: <defaults>
</compile_context>

<pallas_src>
import functools
import math

import jax
import jax.numpy as jnp
from jax import lax
from jax.experimental import pallas as pl
from jax.experimental.pallas import tpu as pltpu


def _qkv_attn_kernel(*refs, scale2, has_encoder, cast_dtype):
    """Per grid step: G batch-heads, a tq-wide query tile, full K/V rows.

    refs (has_encoder=False): q(G,C,tq), k(G,C,T), v(G,C,T), o(G,C,tq)
    refs (has_encoder=True):  q, k, v, ek(G,C,Se), ev(G,C,Se), o
    """
    if has_encoder:
        q_ref, k_ref, v_ref, ek_ref, ev_ref, o_ref = refs
    else:
        q_ref, k_ref, v_ref, o_ref = refs

    # Apply the full softmax scale once to q: (ch**-0.25)**2 == 1/sqrt(ch).
    q = q_ref[...] * scale2                         # [G, C, tq]
    k = k_ref[...]                                  # [G, C, T]
    v = v_ref[...]                                  # [G, C, T]
    if cast_dtype is not None:
        q = q.astype(cast_dtype)
        k = k.astype(cast_dtype)
        v = v.astype(cast_dtype)

    # Scores oriented [G, S, tq]: both dots contract C / S on non-lane dims of
    # the RHS, so the probability matrix never needs an XLU relayout.
    dn_s = (((1,), (1,)), ((0,), (0,)))             # k [G,C,S] x q [G,C,tq] -> [G,S,tq]
    dn_av = (((2,), (1,)), ((0,), (0,)))            # v [G,C,S] x e [G,S,tq] -> [G,C,tq]

    s_self = lax.dot_general(k, q, dn_s, preferred_element_type=jnp.float32)
    if has_encoder:
        ek = ek_ref[...]
        ev = ev_ref[...]
        if cast_dtype is not None:
            ek = ek.astype(cast_dtype)
            ev = ev.astype(cast_dtype)
        s_enc = lax.dot_general(ek, q, dn_s, preferred_element_type=jnp.float32)
        m = jnp.maximum(jnp.max(s_self, axis=1, keepdims=True),
                        jnp.max(s_enc, axis=1, keepdims=True))       # [G,1,tq]
        e_self = jnp.exp(s_self - m)
        e_enc = jnp.exp(s_enc - m)
        l = (jnp.sum(e_self, axis=1, keepdims=True)
             + jnp.sum(e_enc, axis=1, keepdims=True))                # [G,1,tq]
        a = lax.dot_general(v, e_self.astype(v.dtype), dn_av,
                            preferred_element_type=jnp.float32)
        a = a + lax.dot_general(ev, e_enc.astype(ev.dtype), dn_av,
                                preferred_element_type=jnp.float32)
    else:
        m = jnp.max(s_self, axis=1, keepdims=True)                   # [G,1,tq]
        e_self = jnp.exp(s_self - m)
        l = jnp.sum(e_self, axis=1, keepdims=True)                   # [G,1,tq]
        a = lax.dot_general(v, e_self.astype(v.dtype), dn_av,
                            preferred_element_type=jnp.float32)

    # Deferred softmax normalization on the small [G, C, tq] accumulator:
    # EUP approximate reciprocal + one Newton step (restores ~f32 accuracy).
    inv_l = pl.reciprocal(l, approx=True)
    inv_l = inv_l * (2.0 - l * inv_l)
    o_ref[...] = (a * inv_l).astype(o_ref.dtype)


def _vmem_plan():
    """(vmem_limit_bytes, planning_budget_bytes), generation-aware."""
    vmem = None
    try:
        info = pltpu.get_tpu_info()
        for attr in ("vmem_capacity_bytes", "vmem_size_bytes", "vmem_bytes"):
            val = getattr(info, attr, None)
            if val:
                vmem = int(val)
                break
    except Exception:
        vmem = None
    if vmem is None:
        vmem = 64 * 1024 * 1024          # conservative (v7x per-TC physical)
    # 40 MiB limit on v7x (64 MiB physical), 64 MiB on v5e/v6e (128 MiB).
    vmem_limit = min(64 * 1024 * 1024, (vmem * 5) // 8)
    budget = vmem_limit // 2             # blocks + f32 temporaries, leave slack
    return vmem_limit, budget


def _pick_tq(T, s_total):
    """Query-tile: multiple of 128 dividing T; 128 for long S_total, else 256."""
    target = 128 if s_total >= 4096 else 256
    if T <= target or T % 128 != 0:
        # TODO(synk): pad-and-mask the query axis for large T not divisible by 128.
        return T
    for cand in range(target, 127, -128):
        if T % cand == 0:
            return cand
    return T


def _pick_g(B, ch, tq, T, s_enc, itemsize, budget):
    """Heads batched per grid step, with honest block + temporary accounting."""
    s_total = T + s_enc
    cands = (32, 16, 8, 4, 2, 1) if tq < 128 else (8, 4, 2, 1)

    def fits(g):
        # Double-buffered q/out tiles and (conservatively) double-buffered
        # resident K/V / encoder K/V blocks.
        blocks = 4 * g * ch * (tq + T + s_enc) * itemsize
        # Live f32 temporaries: ~2 full [S_total, tq] score/exp buffers
        # (exp is fused; the normalized p matrix is never built) + accumulator.
        temps = 2 * g * s_total * tq * 4 + g * ch * tq * 4
        return blocks + temps <= budget

    # Prefer >= 2 b-blocks so a v7x megacore split lands on the head/batch axis.
    for g in cands:
        if B % g == 0 and (B // g) >= 2 and fits(g):
            return g
    for g in cands:
        if B % g == 0 and fits(g):
            return g
    return 1


def qkv_attention(qkv, n_heads, encoder_kv=None, cast_to_bf16=False):
    """JAX/Pallas equivalent of QKVAttention.forward.

    :param qkv: [N, H*3*C, T]
    :param encoder_kv: optional [N, H*2*C, S_enc]
    :param cast_to_bf16: feed the MXU in bf16 (f32 accumulation); small accuracy
        deviation vs the f32 reference, so off by default.
    :return: [N, H*C, T]
    """
    bs, width, length = qkv.shape
    assert width % (3 * n_heads) == 0
    ch = width // (3 * n_heads)
    B = bs * n_heads
    T = length

    # Free reshapes (no data movement); q/k/v selection happens in the BlockSpec
    # index_map along the 3C axis (no HBM re-slicing / concat in plain JAX).
    qkv_r = qkv.reshape(B, 3 * ch, T)
    has_encoder = encoder_kv is not None
    if has_encoder:
        assert encoder_kv.shape[1] == n_heads * ch * 2
        ekv_r = encoder_kv.reshape(B, 2 * ch, -1)
        s_enc = ekv_r.shape[-1]
    else:
        s_enc = 0
    s_total = T + s_enc

    itemsize = qkv.dtype.itemsize
    sublane = 8 if itemsize == 4 else (16 if itemsize == 2 else 32)
    # TODO(synk): fall back to whole-row (1, 3*ch, T) blocks + in-kernel slicing
    # when ch is not sublane-aligned.
    assert ch % sublane == 0, "per-head channels must be sublane-aligned for tiling"

    scale2 = 1.0 / math.sqrt(ch)          # (ch ** -0.25) ** 2, applied to q only
    vmem_limit, budget = _vmem_plan()
    tq = _pick_tq(T, s_total)
    G = _pick_g(B, ch, tq, T, s_enc, itemsize, budget)
    grid = (B // G, T // tq)

    in_specs = [
        pl.BlockSpec((G, ch, tq), lambda b, t: (b, 0, t)),   # q tile
        pl.BlockSpec((G, ch, T),  lambda b, t: (b, 1, 0)),   # k (resident over t)
        pl.BlockSpec((G, ch, T),  lambda b, t: (b, 2, 0)),   # v (resident over t)
    ]
    inputs = [qkv_r, qkv_r, qkv_r]
    if has_encoder:
        in_specs += [
            pl.BlockSpec((G, ch, s_enc), lambda b, t: (b, 0, 0)),   # ek
            pl.BlockSpec((G, ch, s_enc), lambda b, t: (b, 1, 0)),   # ev
        ]
        inputs += [ekv_r, ekv_r]

    flops = 4 * B * T * s_total * ch                      # two matmuls
    bytes_accessed = (qkv.size
                      + (encoder_kv.size if has_encoder else 0)
                      + B * ch * T) * itemsize

    cast_dtype = jnp.bfloat16 if (cast_to_bf16 and qkv.dtype == jnp.float32) else None

    out = pl.pallas_call(
        functools.partial(_qkv_attn_kernel, scale2=scale2,
                          has_encoder=has_encoder, cast_dtype=cast_dtype),
        out_shape=jax.ShapeDtypeStruct((B, ch, T), qkv.dtype),
        grid=grid,
        in_specs=in_specs,
        out_specs=pl.BlockSpec((G, ch, tq), lambda b, t: (b, 0, t)),
        compiler_params=pltpu.CompilerParams(
            # b is "parallel" (megacore splits on heads, K/V fetched once per
            # core-local head group); t is the sequential inner loop.
            dimension_semantics=("parallel", "arbitrary"),
            vmem_limit_bytes=int(vmem_limit)),
        cost_estimate=pl.CostEstimate(
            flops=int(flops),
            transcendentals=int(B * T * s_total),
            bytes_accessed=int(bytes_accessed)),
    )(*inputs)

    return out.reshape(bs, n_heads * ch, T)       # free reshape


def _reference(qkv, n_heads, encoder_kv=None):
    """Pure-JAX reference mirroring the PyTorch forward exactly."""
    bs, width, length = qkv.shape
    ch = width // (3 * n_heads)
    qkv_r = qkv.reshape(bs * n_heads, 3 * ch, length)
    q, k, v = qkv_r[:, :ch], qkv_r[:, ch:2 * ch], qkv_r[:, 2 * ch:]
    if encoder_kv is not None:
        ekv = encoder_kv.reshape(bs * n_heads, 2 * ch, -1)
        ek, ev = ekv[:, :ch], ekv[:, ch:]
        k = jnp.concatenate([ek, k], axis=-1)
        v = jnp.concatenate([ev, v], axis=-1)
    scale = 1.0 / math.sqrt(math.sqrt(ch))
    w = jnp.einsum('bct,bcs->bts', q * scale, k * scale)
    w = jax.nn.softmax(w.astype(jnp.float32), axis=-1).astype(w.dtype)
    a = jnp.einsum('bts,bcs->bct', w, v)
    return a.reshape(bs, -1, length)


if __name__ == "__main__":
    key = jax.random.PRNGKey(0)
    k1, k2, k3 = jax.random.split(key, 3)

    # Small shapes: self-attention and cross-attention (encoder_kv) paths.
    bs, n_heads, ch, T, S_enc = 2, 2, 8, 16, 8
    width = n_heads * 3 * ch  # 48
    qkv = jax.random.normal(k1, (bs, width, T), dtype=jnp.float32)
    encoder_kv = jax.random.normal(k2, (bs, n_heads * 2 * ch, S_enc),
                                   dtype=jnp.float32)

    out_self = jax.block_until_ready(qkv_attention(qkv, n_heads))
    ref_self = _reference(qkv, n_heads)
    assert out_self.shape == (bs, n_heads * ch, T)
    assert jnp.allclose(out_self, ref_self, atol=1e-4, rtol=1e-4)

    out_cross = jax.block_until_ready(qkv_attention(qkv, n_heads, encoder_kv))
    ref_cross = _reference(qkv, n_heads, encoder_kv)
    assert out_cross.shape == (bs, n_heads * ch, T)
    assert jnp.allclose(out_cross, ref_cross, atol=1e-4, rtol=1e-4)

    # Longer sequence: exercises the query-tiling (tq=256) path.
    bs2, heads2, ch2, T2 = 1, 2, 8, 512
    qkv2 = jax.random.normal(k3, (bs2, heads2 * 3 * ch2, T2), dtype=jnp.float32)
    out2 = jax.block_until_ready(qkv_attention(qkv2, heads2))
    ref2 = _reference(qkv2, heads2)
    assert out2.shape == (bs2, heads2 * ch2, T2)
    assert jnp.allclose(out2, ref2, atol=1e-4, rtol=1e-4)

    print("KERNEL_OK")
</pallas_src>

<mosaic_0001>
module attributes {stable_mosaic.version = 11 : i64} {
  func.func @_qkv_attn_kernel(%arg0: i32, %arg1: i32, %arg2: memref<2x8x16xf32, #tpu.memory_space<vmem>>, %arg3: memref<2x8x16xf32, #tpu.memory_space<vmem>>, %arg4: memref<2x8x16xf32, #tpu.memory_space<vmem>>, %arg5: memref<2x8x16xf32, #tpu.memory_space<vmem>>) attributes {dimension_semantics = [#tpu.dimension_semantics<parallel>, #tpu.dimension_semantics<arbitrary>], iteration_bounds = array<i64: 2, 1>, scalar_prefetch = 0 : i64, scratch_operands = 0 : i64, tpu.core_type = #tpu.core_type<tc>, window_params = [{transform_indices = @transform_0, window_bounds = array<i64: 2, 8, 16>}, {transform_indices = @transform_1, window_bounds = array<i64: 2, 8, 16>}, {transform_indices = @transform_2, window_bounds = array<i64: 2, 8, 16>}, {transform_indices = @transform_3, window_bounds = array<i64: 2, 8, 16>}]} {
    %c0 = arith.constant 0 : index
    %c0_0 = arith.constant 0 : index
    %c0_1 = arith.constant 0 : index
    %0 = vector.load %arg2[%c0, %c0_0, %c0_1] : memref<2x8x16xf32, #tpu.memory_space<vmem>>, vector<2x8x16xf32>
    %cst = arith.constant 0.353553385 : f32
    %1 = vector.broadcast %cst : f32 to vector<2x8x16xf32>
    %2 = arith.mulf %0, %1 : vector<2x8x16xf32>
    %c0_2 = arith.constant 0 : index
    %c0_3 = arith.constant 0 : index
    %c0_4 = arith.constant 0 : index
    %3 = vector.load %arg3[%c0_2, %c0_3, %c0_4] : memref<2x8x16xf32, #tpu.memory_space<vmem>>, vector<2x8x16xf32>
    %c0_5 = arith.constant 0 : index
    %c0_6 = arith.constant 0 : index
    %c0_7 = arith.constant 0 : index
    %4 = vector.load %arg4[%c0_5, %c0_6, %c0_7] : memref<2x8x16xf32, #tpu.memory_space<vmem>>, vector<2x8x16xf32>
    %cst_8 = arith.constant dense<0.000000e+00> : vector<2x16x16xf32>
    %5 = tpu.matmul %3, %2, %cst_8 {dimension_numbers = #tpu.dot_dimension_numbers<[1], [1], [2], [2], [0, 0, 0, 2, 1, 2], [0], [0]>} : vector<2x8x16xf32>, vector<2x8x16xf32>, vector<2x16x16xf32> -> vector<2x16x16xf32>
    %cst_9 = arith.constant dense<0xFF800000> : vector<2x16xf32>
    %6 = vector.multi_reduction <maximumf>, %5, %cst_9 [1] : vector<2x16x16xf32> to vector<2x16xf32>
    %7 = vector.shape_cast %6 : vector<2x16xf32> to vector<2x1x16xf32>
    %8 = vector.broadcast %7 : vector<2x1x16xf32> to vector<2x16x16xf32>
    %9 = arith.subf %5, %8 : vector<2x16x16xf32>
    %10 = math.exp %9 : vector<2x16x16xf32>
    %cst_10 = arith.constant dense<0.000000e+00> : vector<2x16xf32>
    %11 = vector.multi_reduction <add>, %10, %cst_10 [1] : vector<2x16x16xf32> to vector<2x16xf32>
    %12 = vector.shape_cast %11 : vector<2x16xf32> to vector<2x1x16xf32>
    %cst_11 = arith.constant dense<0.000000e+00> : vector<2x8x16xf32>
    %13 = tpu.matmul %4, %10, %cst_11 {dimension_numbers = #tpu.dot_dimension_numbers<[2], [1], [1], [2], [0, 0, 0, 1, 1, 2], [0], [0]>} : vector<2x8x16xf32>, vector<2x16x16xf32>, vector<2x8x16xf32> -> vector<2x8x16xf32>
    %14 = tpu.reciprocal %12 {approx = true} : vector<2x1x16xf32> -> vector<2x1x16xf32>
    %15 = arith.mulf %12, %14 : vector<2x1x16xf32>
    %cst_12 = arith.constant 2.000000e+00 : f32
    %16 = vector.broadcast %cst_12 : f32 to vector<2x1x16xf32>
    %17 = arith.subf %16, %15 : vector<2x1x16xf32>
    %18 = arith.mulf %14, %17 : vector<2x1x16xf32>
    %19 = vector.broadcast %18 : vector<2x1x16xf32> to vector<2x8x16xf32>
    %20 = arith.mulf %13, %19 : vector<2x8x16xf32>
    %c0_13 = arith.constant 0 : index
    %c0_14 = arith.constant 0 : index
    %c0_15 = arith.constant 0 : index
    %21 = vector.load %arg5[%c0_13, %c0_14, %c0_15] : memref<2x8x16xf32, #tpu.memory_space<vmem>>, vector<2x8x16xf32>
    tpu.vector_store %arg5[%c0_13, %c0_14, %c0_15], %20 {strides = array<i32>} : memref<2x8x16xf32, #tpu.memory_space<vmem>>, vector<2x8x16xf32>,
    return
  }
  func.func @transform_0(%arg0: i32, %arg1: i32) -> (i32, i32, i32) {
    %c0_i32 = arith.constant 0 : i32
    %c0_i32_0 = arith.constant 0 : i32
    return %arg0, %c0_i32, %arg1 : i32, i32, i32
  }
  func.func @transform_1(%arg0: i32, %arg1: i32) -> (i32, i32, i32) {
    %c1_i32 = arith.constant 1 : i32
    %c0_i32 = arith.constant 0 : i32
    %c0_i32_0 = arith.constant 0 : i32
    return %arg0, %c1_i32, %c0_i32 : i32, i32, i32
  }
  func.func @transform_2(%arg0: i32, %arg1: i32) -> (i32, i32, i32) {
    %c2_i32 = arith.constant 2 : i32
    %c0_i32 = arith.constant 0 : i32
    %c0_i32_0 = arith.constant 0 : i32
    return %arg0, %c2_i32, %c0_i32 : i32, i32, i32
  }
  func.func @transform_3(%arg0: i32, %arg1: i32) -> (i32, i32, i32) {
    %c0_i32 = arith.constant 0 : i32
    %c0_i32_0 = arith.constant 0 : i32
    return %arg0, %c0_i32, %arg1 : i32, i32, i32
  }
}

</mosaic_0001>

<bundles_post_ra>
// kernel: tpu_custom_call.1
= control target key start
LH: loop header
LB: loop body
LE: loop exit
PB: predicated region body
PF: predicated region fallthrough
CT: control target
= control target key end

     0   :  { %8 = vsyncpa [#allocation6], 0  ;;  %s1345_s0 = inlined_call_operand.vmem [shape: f32[4,24,16], index: 0, kind: input, shape index: {}]   ;;  %s1346_s1 = inlined_call_operand.vmem [shape: f32[4,24,16], index: 1, kind: input, shape index: {}]   ;;  %s1347_s2 = inlined_call_operand.vmem [shape: f32[4,24,16], index: 2, kind: input, shape index: {}]   ;;  %s1348_s3 = inlined_call_operand.hbm [shape: f32[4,8,16], index: 3, kind: output, shape index: {}]  }
   0x1   :  { %10 = vsyncpa [#allocation6 + $0x1], 0  ;;  %s1183_s12 = smov 0   ;;  %s1185_s13 = smov 0  }
   0x2   :  { %s1187_s14 = smov 0   ;;  %s1189_s15 = smov 0  }
   0x3   :  { %s1191_s16 = smov 0   ;;  %s1193_s17 = smov 0  }
   0x4 LB: > { %s929_s18 = sadd.s32 4294967295, %s1155_s17   ;;  %s930_s19 = sadd.s32 4294967294, %s1155_s17   ;;  %s1155_s17 = sphi %s1193_s17, %s16_s17   ;;  %s1151_s16 = sphi %s1191_s16, %s1356_s16   ;;  %s1147_s15 = sphi %s1189_s15, %s1355_s15   ;;  %s1143_s14 = sphi %s1187_s14, %s1354_s14   ;;  %s1139_s13 = sphi %s1185_s13, %s1353_s13   ;;  %s1135_s12 = sphi %s1183_s12, %s1352_s12  }
   0x5   : > { %s28_s20 = sadd.s32 1, %s1151_s16  ;;  %s37_s21 = sadd.s32 1, %s1143_s14 }
   0x6   : > { %p30_p0 = scmp.ge.s32.totalorder %s28_s20, 2  ;;  %p44_p1 = scmp.ne.s32.totalorder %s1143_s14, %s1139_s13 }
   0x7   : > { %p45_p2 = scmp.eq.s32.totalorder %s1155_s17, 0  ;;  %p128_p3 = scmp.eq.s32.totalorder %s929_s18, 1 }
   0x8   : > { %s1358_s20 = smov (%p30_p0, %s28_s20), 0  ;;  %p133_p6 = scmp.ne.s32.totalorder %s1139_s13, %s1135_s12 }
   0x9   : > { %p1222_p4 = por %p45_p2, %p44_p1  ;;  %p1226_p5 = por %p128_p3, %p44_p1 }
   0xa   : > { %s32_s24 = ssub.s32 %s1151_s16, %s1358_s20  ;;  %p134_p8 = scmp.eq.s32.totalorder %s930_s19, 1 }
   0xb   : > { %p35_p7 = scmp.eq.s32.totalorder %s32_s24, 0  ;;  %p932_p10 = scmp.ge.s32.totalorder %s1155_s17, 2 }
   0xc   : > { %p1237_p9 = por %p134_p8, %p133_p6 }
   0xd   : > { %s1235_s25 = scalar_select %p35_p7, %s1143_s14, %s37_s21  }
   0xe   : > { %150 = sbr.rel (%p932_p10) target bundleno = 42 (0x2a), region = 16 }
  0x15   : > { %153 = sbr.rel (!%p1222_p4) target bundleno = 28 (0x1c), region = 20  ;;  %s155_s27 = sand.u32 (%p1222_p4), 1, %s1143_s14  }
  0x16   : > { %s1004_s28 = smul.u32 (%p1222_p4), 48, %s1151_s16  ;;  %s933_s29 = sshll.u32 (%p1222_p4), %s155_s27, 4 }
  0x17   : > { %s157_s6 = scalar_lea.vmem (%p1222_p4), [#allocation2], %s933_s29 }
  0x18   : > { %s162_s5 = scalar_lea.vmem (%p1222_p4), %s1345_s0, %s1004_s28 }
  0x19   : > { %v192_v0 = vld [vmem:[%s162_s5] sm:$0xff] (%p1222_p4)  ;;  %v194_v1 = vld [vmem:[%s162_s5 + $0x18] sm:$0xff] (%p1222_p4) }
  0x1a   : > { %193 = vst [vmem:[%s157_s6] sm:$0xff] (%p1222_p4), %v192_v0  ;;  %195 = vst [vmem:[%s157_s6 + $0x8] sm:$0xff] (%p1222_p4), %v194_v1 }
  0x1c PF: > { %201 = sbr.rel (!%p1222_p4) target bundleno = 35 (0x23), region = 58  ;;  %s203_s7 = sand.u32 (%p1222_p4), 1, %s1143_s14  }
  0x1d   : > { %s938_s8 = smul.u32 (%p1222_p4), 48, %s1151_s16  ;;  %s937_s9 = sshll.u32 (%p1222_p4), %s203_s7, 4 }
  0x1e   : > { %s205_s19 = scalar_lea.vmem (%p1222_p4), [#allocation3], %s937_s9 }
  0x1f   : > { %s843_s18 = scalar_lea.vmem (%p1222_p4), %s1346_s1, %s938_s8 }
  0x20   : > { %v939_v2 = vld [vmem:[%s843_s18 + $0x8] sm:$0xff] (%p1222_p4)  ;;  %v940_v3 = vld [vmem:[%s843_s18 + $0x20] sm:$0xff] (%p1222_p4) }
  0x21   : > { %241 = vst [vmem:[%s205_s19] sm:$0xff] (%p1222_p4), %v939_v2  ;;  %243 = vst [vmem:[%s205_s19 + $0x8] sm:$0xff] (%p1222_p4), %v940_v3 }
  0x23 PF: > { %249 = sbr.rel (!%p1222_p4) target bundleno = 42 (0x2a), region = 96  ;;  %s251_s21 = sand.u32 (%p1222_p4), 1, %s1143_s14  }
  0x24   : > { %s942_s24 = smul.u32 (%p1222_p4), 48, %s1151_s16  ;;  %s941_s27 = sshll.u32 (%p1222_p4), %s251_s21, 4 }
  0x25   : > { %s253_s4 = scalar_lea.vmem (%p1222_p4), [#allocation4], %s941_s27 }
  0x26   : > { %s849_s30 = scalar_lea.vmem (%p1222_p4), %s1347_s2, %s942_s24 }
  0x27   : > { %v943_v4 = vld [vmem:[%s849_s30 + $0x10] sm:$0xff] (%p1222_p4)  ;;  %v944_v5 = vld [vmem:[%s849_s30 + $0x28] sm:$0xff] (%p1222_p4) }
  0x28   : > { %289 = vst [vmem:[%s253_s4] sm:$0xff] (%p1222_p4), %v943_v4  ;;  %291 = vst [vmem:[%s253_s4 + $0x8] sm:$0xff] (%p1222_p4), %v944_v5 }
  0x2a PF: > { %p945_p11 = scmp.ge.s32.totalorder %s1155_s17, 1  ;;  %p296_p12 = scmp.lt.s32.totalorder %s1155_s17, 3 }
  0x2c   : > { %p297_p13 = pnand %p945_p11, %p296_p12 }
  0x2d   : > { %s303_s22 = sand.u32 (!%p297_p13), 1, %s1139_s13   ;;  %vm392_vm0 = vcmask (!%p297_p13), 64512   ;;  %v1157_v16 = vmov (!%p297_p13), 0.0|0.0   ;;  %vm1158_vm1 = vmmov (!%p297_p13), 0   ;;  %v1159_v17 = vmov (!%p297_p13), 0.0   ;;  %s961_s11 = sshll.u32 (!%p297_p13), %s1147_s15, 8 }
  0x2e   : > { %300 = sbr.rel (%p297_p13) target bundleno = 668 (0x29c), region = 134  ;;  %s1270_s5 = sshll.u32 (!%p297_p13), %s303_s22, 4  ;;  %vm587_vm2 = vcmask (!%p297_p13), 130048  }
  0x2f   : > { %s312_s6 = scalar_lea.vmem (!%p297_p13), [#allocation3], %s1270_s5  ;;  %s305_s7 = scalar_lea.vmem (!%p297_p13), [#allocation2], %s1270_s5 }
  0x30   : > { %v356_v6 = vld [vmem:[%s312_s6] sm:$0xff] (!%p297_p13)  ;;  %v357_v9 = vld [vmem:[%s312_s6 + $0x8] sm:$0xff] (!%p297_p13)  ;;  %s319_s8 = scalar_lea.vmem (!%p297_p13), [#allocation4], %s1270_s5  ;;  %s347_s9 = scalar_lea.vmem (!%p297_p13), [#allocation5], %s1270_s5 }
  0x31   : > { %360 = vxpose.xlu0.b32.start.end [1/1] (short) (narrow) (!%p297_p13), %v356_v6, 16  ;;  %v352_v7 = vld [vmem:[%s305_s7] sm:$0xff] (!%p297_p13)  ;;  %v353_v10 = vld [vmem:[%s305_s7 + $0x8] sm:$0xff] (!%p297_p13)  ;;  %s809_s10 = sshll.u32 (!%p297_p13), %s347_s9, 4  ;;  %s1293_s21 = scalar_lea.hbm (!%p297_p13), %s1348_s3, %s961_s11  ;;  %s1288_s10 = int_to_ptr.vmem [resolvable:$true] %s809_s10 }
  0x32   : > { %v354_v8 = vmul.f32 (!%p297_p13), 0.35355338, %v352_v7  ;;  %v355_v11 = vmul.f32 (!%p297_p13), 0.35355338, %v353_v10  ;;  %v358_v54 = vld [vmem:[%s319_s8] sm:$0xff] (!%p297_p13)  ;;  %v359_v61 = vld [vmem:[%s319_s8 + $0x8] sm:$0xff] (!%p297_p13) }
  0x33   : > { %s1298_s24 = scalar_lea.sflag (!%p297_p13), [#allocation6], %s303_s22  ;;  %s1077_s15 = scalar_lea.vmem (!%p297_p13), %s1288_s10, 256 }
  0x34   : > { %974 = vmatprep.subr.mxu0 (!%p297_p13), %v354_v8  ;;  %979 = vmatprep.subr.mxu1 (!%p297_p13), %v355_v11  ;;  %p1078_p0 = scmp.ne.s32.totalorder (!%p297_p13), %s1288_s10, %s1077_s15  ;;  %s1160_s27 = smov (!%p297_p13), [#allocation5]  }
  0x35   : > { %975 = vmatpush3.msra.mxu0 %v354_v8  ;;  %980 = vmatpush3.msra.mxu1 %v355_v11  ;;  %s1081_s28 = sshll.u32 %s1160_s27, 4  ;;  %s1082_s28 = int_to_ptr.vmem [resolvable:$false] %s1081_s28 }
  0x36   : > { %474 = vxpose.xlu0.b32.start.end [1/1] (short) (narrow) %v357_v9, 16  ;;  %998 = vmatprep.subr.bf16.mxu0 %v1157_v16  ;;  %p1079_p1 = pnand %p1078_p0, %p1226_p5  ;;  %s1083_s29 = scalar_lea.vmem %s1082_s28, 512 }
  0x37   : > { %1001 = vmatprep.subr.bf16.mxu1 %v1157_v16  ;;  %p1084_p3 = scmp.lt.s32.totalorder %s1288_s10, %s1082_s28  ;;  %p1085_p4 = scmp.lt.s32.totalorder %s1083_s29, %s1077_s15 }
  0x38   : > { %p1080_p2 = pneg %p1079_p1 }
  0x39   : > { %p1086_p6 = por %p1085_p4, %p1084_p3 }
  0x3b   : > { %p1087_p7 = pnand %p1086_p6, %p1080_p2 }
  0xb1   : > { %v376_v12 = vpop.trf.xlu0 }
  0xb2   : > { %976 = vmatprep.mubr.msk.f32.mxu0 %vm392_vm0, %v376_v12 }
  0xb5   : > { %v377_v13 = vpop.trf.xlu0 }
  0xb6   : > { %977 = vmatmul.mubr.msk.f32.vlgmr.msra.gmra.mrb[0].mxu0 %vm392_vm0, %v377_v13 }
  0xb7   : > { %988 = vmatprep.mubr.msk.f32.mxu0 %vm1158_vm1, %v1159_v17 }
  0xb9   : > { %v490_v14 = vpop.trf.xlu0 }
  0xba   : > { %981 = vmatprep.mubr.msk.f32.mxu1 %vm392_vm0, %v490_v14 }
  0xbd   : > { %v491_v15 = vpop.trf.xlu0 }
  0xbe   : > { %982 = vmatmul.mubr.msk.f32.vlgmr.msra.gmra.mrb[0].mxu1 %vm392_vm0, %v491_v15 }
  0xbf   : > { %995 = vmatprep.mubr.msk.f32.mxu1 %vm1158_vm1, %v1159_v17 }
 0x189   : > { %v978_v18 = vpop.f32.mrb[0].mxu0 }
 0x18a   : > { %v589_v19 = vsel %vm587_vm2, %v978_v18, -inf  ;;  %v465_v20 = vpop.f32.mrb[1].mxu0 }
 0x18b   : > { %v588_v21 = vsel %vm587_vm2, %v465_v20, -inf }
 0x18c   : > { %v590_v22 = vmax.f32 %v588_v21, %v589_v19 }
 0x18e   : > { %v591_v23 = vrot.slane %v590_v22, 4 }
 0x190   : > { %v592_v24 = vmax.f32 %v590_v22, %v591_v23 }
 0x191   : > { %v983_v25 = vpop.f32.mrb[0].mxu1 }
 0x192   : > { %v593_v26 = vrot.slane %v592_v24, 2  ;;  %v598_v27 = vsel %vm587_vm2, %v983_v25, -inf  ;;  %v578_v28 = vpop.f32.mrb[1].mxu1 }
 0x193   : > { %v597_v29 = vsel %vm587_vm2, %v578_v28, -inf }
 0x194   : > { %v594_v30 = vmax.f32 %v592_v24, %v593_v26  ;;  %v599_v31 = vmax.f32 %v597_v29, %v598_v27 }
 0x196   : > { %v595_v32 = vrot.slane %v594_v30, 1  ;;  %v600_v33 = vrot.slane %v599_v31, 4 }
 0x198   : > { %v596_v34 = vmax.f32 %v594_v30, %v595_v32  ;;  %v601_v35 = vmax.f32 %v599_v31, %v600_v33 }
 0x19a   : > { %v606_v36 = vsub.f32 %v465_v20, %v596_v34  ;;  %v607_v37 = vsub.f32 %v978_v18, %v596_v34  ;;  %v602_v38 = vrot.slane %v601_v35, 2 }
 0x19c   : > { %v610_v39 = vmul.f32 1.442695, %v606_v36  ;;  %v612_v40 = vmul.f32 1.442695, %v607_v37  ;;  %v603_v41 = vmax.f32 %v601_v35, %v602_v38 }
 0x19e   : > { %1065 = vpow2.f32 %v610_v39  ;;  %v604_v42 = vrot.slane %v603_v41, 1 }
 0x19f   : > { %1067 = vpow2.f32 %v612_v40 }
 0x1a0   : > { %v605_v43 = vmax.f32 %v603_v41, %v604_v42 }
 0x1a2   : > { %v608_v44 = vsub.f32 %v578_v28, %v605_v43  ;;  %v609_v45 = vsub.f32 %v983_v25, %v605_v43 }
 0x1a4   : > { %v614_v46 = vmul.f32 1.442695, %v608_v44  ;;  %v616_v47 = vmul.f32 1.442695, %v609_v45 }
 0x1a6   : > { %1069 = vpow2.f32 %v614_v46 }
 0x1a7   : > { %1071 = vpow2.f32 %v616_v47 }
 0x1a8   : > { %v1066_v48 = vpop.eup %1065 }
 0x1a9   : > { %v1068_v49 = vpop.eup %1067  ;;  %v618_v50 = vsel %vm587_vm2, %v1066_v48, 0.0 }
 0x1aa   : > { %v999_v51 = vpack.c.bf16 %v1068_v49, %v1066_v48  ;;  %v619_v52 = vsel %vm587_vm2, %v1068_v49, 0.0 }
 0x1ab   : > { %v620_v53 = vadd.f32 %v619_v52, %v618_v50 }
 0x1ac   : > { %1000 = vmatpush3.bf16.msra.mxu0 %v999_v51 }
 0x1ad   : > { %v621_v62 = vrot.slane %v620_v53, 4 }
 0x1af   : > { %989 = vmatmul.mubr.msk.f32.vlgmr.msra.gmra.mrb[2].mxu0 %vm587_vm2, %v358_v54  ;;  %v622_v63 = vadd.f32 %v621_v62, %v620_v53 }
 0x1b0   : > { %v1070_v55 = vpop.eup %1069 }
 0x1b1   : > { %v1072_v56 = vpop.eup %1071  ;;  %v627_v57 = vsel %vm587_vm2, %v1070_v55, 0.0  ;;  %v623_v0 = vrot.slane %v622_v63, 2 }
 0x1b2   : > { %v1002_v58 = vpack.c.bf16 %v1072_v56, %v1070_v55  ;;  %v628_v59 = vsel %vm587_vm2, %v1072_v56, 0.0 }
 0x1b3   : > { %v629_v60 = vadd.f32 %v628_v59, %v627_v57  ;;  %v624_v2 = vadd.f32 %v623_v0, %v622_v63 }
 0x1b4   : > { %1003 = vmatpush3.bf16.msra.mxu1 %v1002_v58 }
 0x1b5   : > { %v630_v1 = vrot.slane %v629_v60, 4  ;;  %v625_v4 = vrot.slane %v624_v2, 1 }
 0x1b7   : > { %996 = vmatmul.mubr.msk.f32.vlgmr.msra.gmra.mrb[2].mxu1 %vm587_vm2, %v359_v61  ;;  %v631_v3 = vadd.f32 %v630_v1, %v629_v60  ;;  %v626_v6 = vadd.f32 %v625_v4, %v624_v2 }
 0x1b9   : > { %v632_v5 = vrot.slane %v631_v3, 2  ;;  %1073 = vrcp.f32 %v626_v6 }
 0x1bb   : > { %v633_v7 = vadd.f32 %v632_v5, %v631_v3 }
 0x1bd   : > { %v634_v8 = vrot.slane %v633_v7, 1 }
 0x1bf   : > { %v635_v9 = vadd.f32 %v634_v8, %v633_v7 }
 0x1c1   : > { %1075 = vrcp.f32 %v635_v9 }
 0x1c3   : > { %v1074_v10 = vpop.eup %1073 }
 0x1c4   : > { %v784_v11 = vmul.f32 %v1074_v10, %v626_v6 }
 0x1c6   : > { %v786_v12 = vsub.f32 2.0, %v784_v11 }
 0x1c8   : > { %v788_v14 = vmul.f32 %v1074_v10, %v786_v12 }
 0x1cb   : > { %v1076_v13 = vpop.eup %1075 }
 0x1cc   : > { %v785_v15 = vmul.f32 %v1076_v13, %v635_v9 }
 0x1ce   : > { %v787_v19 = vsub.f32 2.0, %v785_v15 }
 0x1d0   : > { %v789_v20 = vmul.f32 %v1076_v13, %v787_v19 }
 0x282   : > { %v705_v16 = vpop.f32.mrb[2].mxu0 }
 0x283   : > { %v790_v17 = vmul.f32 %v788_v14, %v705_v16  ;;  %v990_v18 = vpop.f32.mrb[3].mxu0 }
 0x285   : > { %792 = vst.msk [vmem:[%s347_s9] sm:$0xff] %vm587_vm2, %v790_v17 }
 0x28a   : > { %v778_v21 = vpop.f32.mrb[2].mxu1 }
 0x28b   : > { %v791_v22 = vmul.f32 %v789_v20, %v778_v21  ;;  %v997_v23 = vpop.f32.mrb[3].mxu1 }
 0x28d   : > { %793 = vst.msk [vmem:[%s347_s9 + $0x8] sm:$0xff] %vm587_vm2, %v791_v22 }
 0x28e   : > { %1090 = shalt.err (!%p1087_p7)
}
 0x28f   : > { %s1091_s30 = scalar_lea.hbm %s1293_s21, 256  ;;  %s1095_s5 = scalar_lea.hbm %s1348_s3, 512 }
 0x290   : > { %p1092_p8 = scmp.ne.s32.totalorder %s1293_s21, %s1091_s30  ;;  %p1096_p13 = scmp.lt.u32.totalorder %s1293_s21, %s1348_s3 }
 0x291   : > { %p1097_p0 = scmp.lt.u32.totalorder %s1095_s5, %s1091_s30  ;;  %p1099_p2 = scmp.lt.u32.totalorder %s1091_s30, %s1293_s21 }
 0x292   : > { %p1093_p11 = pnand %p1092_p8, %p1226_p5 }
 0x293   : > { %p1098_p1 = por %p1097_p0, %p1096_p13 }
 0x294   : > { %p1094_p12 = pneg %p1093_p11 }
 0x295   : > { %p1100_p3 = por %p1099_p2, %p1098_p1 }
 0x297   : > { %p1101_p4 = pnand %p1100_p3, %p1094_p12 }
 0x299   : > { %1104 = shalt.err (!%p1101_p4)
}
 0x29a   : > { %s1161_s8 = smov 128   ;;  %s1162_s9 = smov 8  }
 0x29b   : > { %1005 = dma.vmem_to_hbm [thread:$0]  (%p1226_p5), %s1288_s10, 256, %s1293_s21, %s1298_s24, %s1161_s8, %s1161_s8, %s1162_s9  }
 0x29c PF: > { %s824_s11 = sand.u32 1, %s1135_s12   ;;  %p1008_p6 = pnand %p932_p10, %p1237_p9 }
 0x29d   : > { %s825_s18 = scalar_lea.sflag [#allocation6], %s824_s11 }
 0x29e   : > { %1130 = dma.done.wait (!%p1008_p6), %s825_s18, 256  }
 0x29f   : > { %1132 = vsyncadd (!%p1008_p6), %s825_s18, 4294967040  ;;  %s16_s17 = sadd.s32 1, %s1155_s17   ;;  %s1352_s12 = smov %s1139_s13 }
 0x2a0   : > { %p13_p7 = scmp.ge.s32.totalorder %s16_s17, 4   ;;  %s1353_s13 = smov %s1143_s14 }
 0x2a1   : > { %s1354_s14 = smov %s1235_s25  ;;  %s1355_s15 = smov %s1151_s16 }
 0x2a2   : > { %s1356_s16 = smov %s1358_s20  ;;  %15 = sbr.rel (!%p13_p7) target bundleno = 4 (0x4), region = 202 }
 0x2a9   :  { %830 = vsyncpa [#allocation6], 1 }
 0x2aa   :  { %832 = vsyncpa [#allocation6 + $0x1], 1 }

</bundles_post_ra>
